<compile_context>
chip_gen: v7x
topology: tpu7x:2x2x1
jax: 0.10.0
libtpu: 0.0.40
codegen_flags: <defaults>
</compile_context>

<pallas_src>
import functools
import math

import jax
import jax.numpy as jnp
from jax.experimental import pallas as pl
from jax.experimental.pallas import tpu as pltpu


def _round_up(n, m):
    return ((n + m - 1) // m) * m


# ---------------------------------------------------------------------------
# Fused kernel: grid = (batch_tiles, layers); layer axis is the carried loop.
# ---------------------------------------------------------------------------
def fused_encoder_kernel(x_ref, w1_ref, b1_ref, w2_ref, b2_ref,
                         w3_ref, b3_ref, wr_ref, br_ref, o_ref, acc_ref):
    l = pl.program_id(1)

    # Load the batch tile from HBM only once (first layer); afterwards the
    # activation lives in the VMEM scratch accumulator.
    @pl.when(l == 0)
    def _():
        acc_ref[...] = x_ref[...]

    x = acc_ref[...]                      # f32 activation, (TILE_B, D_pad)
    x_bf = x.astype(jnp.bfloat16)         # MXU operands in bf16

    # encoder branch: Linear -> ReLU -> Linear -> ReLU -> Linear -> ReLU
    h = jnp.dot(x_bf, w1_ref[...], preferred_element_type=jnp.float32)
    h = jnp.maximum(h + b1_ref[...], 0.0)
    h = jnp.dot(h.astype(jnp.bfloat16), w2_ref[...],
                preferred_element_type=jnp.float32)
    h = jnp.maximum(h + b2_ref[...], 0.0)
    h = jnp.dot(h.astype(jnp.bfloat16), w3_ref[...],
                preferred_element_type=jnp.float32)
    h = jnp.maximum(h + b3_ref[...], 0.0)

    # residual branch: Linear
    r = jnp.dot(x_bf, wr_ref[...], preferred_element_type=jnp.float32)
    out = h + r + br_ref[...]

    acc_ref[...] = out                    # carry to next layer (stays in VMEM)

    @pl.when(l == pl.num_programs(1) - 1)
    def _():
        o_ref[...] = out.astype(o_ref.dtype)


def encoder_pallas(x, packed, *, feature_dim, tile_b=128):
    """Runs the whole encoder (all layers) in one pallas_call."""
    w1s, b1s, w2s, b2s, w3s, b3s, wrs, brs = packed
    L, D_pad, M_pad = w1s.shape

    B, in_dim = x.shape
    TILE_B = min(tile_b, _round_up(B, 8))
    B_pad = _round_up(B, TILE_B)

    # Zero-pad batch (sublanes) and feature dim (lanes); padded lanes stay
    # exactly zero through every layer because padded weight rows/cols and
    # biases are zero.
    x_pad = jnp.pad(x.astype(jnp.float32),
                    ((0, B_pad - B), (0, D_pad - in_dim)))

    grid = (B_pad // TILE_B, L)

    def layer_spec(arr):
        # stacked per-layer tensor [L, a, b] -> kernel sees (a, b) for layer l
        a, b = arr.shape[1], arr.shape[2]
        return pl.BlockSpec((pl.Squeezed(), a, b), lambda bi, li: (li, 0, 0))

    act_spec = pl.BlockSpec((TILE_B, D_pad), lambda bi, li: (bi, 0))

    out = pl.pallas_call(
        fused_encoder_kernel,
        out_shape=jax.ShapeDtypeStruct((B_pad, D_pad), jnp.float32),
        grid_spec=pltpu.PrefetchScalarGridSpec(
            num_scalar_prefetch=0,
            grid=grid,
            in_specs=[
                act_spec,
                layer_spec(w1s), layer_spec(b1s),
                layer_spec(w2s), layer_spec(b2s),
                layer_spec(w3s), layer_spec(b3s),
                layer_spec(wrs), layer_spec(brs),
            ],
            out_specs=act_spec,
            scratch_shapes=[pltpu.VMEM((TILE_B, D_pad), jnp.float32)],
        ),
        compiler_params=pltpu.CompilerParams(
            dimension_semantics=("parallel", "arbitrary")),
    )(x_pad, w1s, b1s, w2s, b2s, w3s, b3s, wrs, brs)

    return out[:B, :feature_dim]


@functools.partial(jax.jit, static_argnames=("feature_dim", "tile_b"))
def encoder_forward(x, packed, *, feature_dim, tile_b=128):
    return encoder_pallas(x, packed, feature_dim=feature_dim, tile_b=tile_b)


# ---------------------------------------------------------------------------
# Parameter init (PyTorch nn.Linear default) and packing to padded/stacked form
# ---------------------------------------------------------------------------
def init_linear(key, fan_in, fan_out):
    """PyTorch nn.Linear default init: U(-1/sqrt(fan_in), 1/sqrt(fan_in))."""
    kw, kb = jax.random.split(key)
    bound = 1.0 / math.sqrt(fan_in)
    # stored as [fan_in, fan_out] so the kernel computes x @ W (== x @ W_pt.T)
    w = jax.random.uniform(kw, (fan_in, fan_out), jnp.float32, -bound, bound)
    b = jax.random.uniform(kb, (1, fan_out), jnp.float32, -bound, bound)
    return w, b


def init_encoder_params(key, input_dim, feature_dim, mid_dim, layers):
    params = []
    in_dim = input_dim
    for _ in range(layers):
        keys = jax.random.split(key, 5)
        key = keys[0]
        w1, b1 = init_linear(keys[1], in_dim, mid_dim)
        w2, b2 = init_linear(keys[2], mid_dim, mid_dim)
        w3, b3 = init_linear(keys[3], mid_dim, feature_dim)
        wr, br = init_linear(keys[4], in_dim, feature_dim)
        params.append((w1, b1, w2, b2, w3, b3, wr, br))
        in_dim = feature_dim
    return params


def pack_encoder_params(params, input_dim, feature_dim, mid_dim):
    """Zero-pad to 128-lane multiples, cast weights to bf16, stack over layers."""
    D_pad = _round_up(max(input_dim, feature_dim), 128)   # activation width
    M_pad = _round_up(mid_dim, 128)

    def pad2(a, rows, cols):
        return jnp.pad(a, ((0, rows - a.shape[0]), (0, cols - a.shape[1])))

    w1s, b1s, w2s, b2s, w3s, b3s, wrs, brs = ([] for _ in range(8))
    for (w1, b1, w2, b2, w3, b3, wr, br) in params:
        w1s.append(pad2(w1, D_pad, M_pad).astype(jnp.bfloat16))
        b1s.append(pad2(b1, 1, M_pad))
        w2s.append(pad2(w2, M_pad, M_pad).astype(jnp.bfloat16))
        b2s.append(pad2(b2, 1, M_pad))
        w3s.append(pad2(w3, M_pad, D_pad).astype(jnp.bfloat16))
        b3s.append(pad2(b3, 1, D_pad))
        wrs.append(pad2(wr, D_pad, D_pad).astype(jnp.bfloat16))
        brs.append(pad2(br, 1, D_pad))

    stack = lambda xs: jnp.stack(xs, axis=0)
    return (stack(w1s), stack(b1s), stack(w2s), stack(b2s),
            stack(w3s), stack(b3s), stack(wrs), stack(brs))


# ---------------------------------------------------------------------------
# Pure-JAX reference (emulates the same bf16 MXU inputs / f32 accumulation)
# ---------------------------------------------------------------------------
def encoder_reference(x, params):
    def mm(a, w):
        return jnp.dot(a.astype(jnp.bfloat16), w.astype(jnp.bfloat16),
                       preferred_element_type=jnp.float32)

    out = x.astype(jnp.float32)
    for (w1, b1, w2, b2, w3, b3, wr, br) in params:
        h = jnp.maximum(mm(out, w1) + b1, 0.0)
        h = jnp.maximum(mm(h, w2) + b2, 0.0)
        h = jnp.maximum(mm(h, w3) + b3, 0.0)
        out = h + (mm(out, wr) + br)
    return out


if __name__ == "__main__":
    # Small shapes consistent with Encoder(input_dim, feature_dim, mid_dim, layers)
    batch, input_dim, feature_dim, mid_dim, layers = 8, 32, 32, 64, 2

    key = jax.random.PRNGKey(0)
    kx, kp = jax.random.split(key)
    x = jax.random.normal(kx, (batch, input_dim), jnp.float32)

    params = init_encoder_params(kp, input_dim, feature_dim, mid_dim, layers)
    packed = pack_encoder_params(params, input_dim, feature_dim, mid_dim)

    y = encoder_forward(x, packed, feature_dim=feature_dim)
    y = jax.block_until_ready(y)

    y_ref = encoder_reference(x, params)
    assert y.shape == (batch, feature_dim)
    assert jnp.allclose(y, y_ref, atol=1e-2, rtol=1e-2), "mismatch vs reference"

    print("KERNEL_OK")
</pallas_src>

<mosaic_0001>
module attributes {stable_mosaic.version = 11 : i64} {
  func.func @fused_encoder_kernel(%arg0: i32, %arg1: i32, %arg2: memref<8x128xf32, #tpu.memory_space<vmem>>, %arg3: memref<1x128x128xbf16, #tpu.memory_space<vmem>>, %arg4: memref<1x1x128xf32, #tpu.memory_space<vmem>>, %arg5: memref<1x128x128xbf16, #tpu.memory_space<vmem>>, %arg6: memref<1x1x128xf32, #tpu.memory_space<vmem>>, %arg7: memref<1x128x128xbf16, #tpu.memory_space<vmem>>, %arg8: memref<1x1x128xf32, #tpu.memory_space<vmem>>, %arg9: memref<1x128x128xbf16, #tpu.memory_space<vmem>>, %arg10: memref<1x1x128xf32, #tpu.memory_space<vmem>>, %arg11: memref<8x128xf32, #tpu.memory_space<vmem>>, %arg12: memref<8x128xf32, #tpu.memory_space<vmem>>) attributes {dimension_semantics = [#tpu.dimension_semantics<parallel>, #tpu.dimension_semantics<arbitrary>], iteration_bounds = array<i64: 1, 2>, scalar_prefetch = 0 : i64, scratch_operands = 1 : i64, tpu.core_type = #tpu.core_type<tc>, window_params = [{transform_indices = @transform_0, window_bounds = array<i64: 8, 128>}, {transform_indices = @transform_1, window_bounds = array<i64: 1, 128, 128>}, {transform_indices = @transform_2, window_bounds = array<i64: 1, 1, 128>}, {transform_indices = @transform_3, window_bounds = array<i64: 1, 128, 128>}, {transform_indices = @transform_4, window_bounds = array<i64: 1, 1, 128>}, {transform_indices = @transform_5, window_bounds = array<i64: 1, 128, 128>}, {transform_indices = @transform_6, window_bounds = array<i64: 1, 1, 128>}, {transform_indices = @transform_7, window_bounds = array<i64: 1, 128, 128>}, {transform_indices = @transform_8, window_bounds = array<i64: 1, 1, 128>}, {transform_indices = @transform_9, window_bounds = array<i64: 8, 128>}]} {
    %c0_i32 = arith.constant 0 : i32
    %0 = arith.cmpi eq, %arg1, %c0_i32 : i32
    %1 = arith.extui %0 : i1 to i32
    %c0_i32_0 = arith.constant 0 : i32
    %2 = arith.cmpi ne, %1, %c0_i32_0 : i32
    scf.if %2 {
      %c0_35 = arith.constant 0 : index
      %c0_36 = arith.constant 0 : index
      %46 = vector.load %arg2[%c0_35, %c0_36] : memref<8x128xf32, #tpu.memory_space<vmem>>, vector<8x128xf32>
      %c0_37 = arith.constant 0 : index
      %c0_38 = arith.constant 0 : index
      %47 = vector.load %arg12[%c0_37, %c0_38] : memref<8x128xf32, #tpu.memory_space<vmem>>, vector<8x128xf32>
      tpu.vector_store %arg12[%c0_37, %c0_38], %46 {strides = array<i32>} : memref<8x128xf32, #tpu.memory_space<vmem>>, vector<8x128xf32>,
    } else {
    }
    %c0 = arith.constant 0 : index
    %c0_1 = arith.constant 0 : index
    %3 = vector.load %arg12[%c0, %c0_1] : memref<8x128xf32, #tpu.memory_space<vmem>>, vector<8x128xf32>
    %4 = arith.truncf %3 : vector<8x128xf32> to vector<8x128xbf16>
    %c0_2 = arith.constant 0 : index
    %c0_3 = arith.constant 0 : index
    %c0_4 = arith.constant 0 : index
    %5 = vector.load %arg3[%c0_2, %c0_3, %c0_4] : memref<1x128x128xbf16, #tpu.memory_space<vmem>>, vector<1x128x128xbf16>
    %6 = vector.shape_cast %5 : vector<1x128x128xbf16> to vector<128x128xbf16>
    %cst = arith.constant dense<0.000000e+00> : vector<8x128xf32>
    %7 = tpu.matmul %4, %6, %cst {dimension_numbers = #tpu.dot_dimension_numbers<[1], [0], [0], [1], [0, 0, 1, 1], [], []>} : vector<8x128xbf16>, vector<128x128xbf16>, vector<8x128xf32> -> vector<8x128xf32>
    %c0_5 = arith.constant 0 : index
    %c0_6 = arith.constant 0 : index
    %c0_7 = arith.constant 0 : index
    %8 = vector.load %arg4[%c0_5, %c0_6, %c0_7] : memref<1x1x128xf32, #tpu.memory_space<vmem>>, vector<1x1x128xf32>
    %9 = vector.shape_cast %8 : vector<1x1x128xf32> to vector<1x128xf32>
    %10 = vector.broadcast %9 : vector<1x128xf32> to vector<8x128xf32>
    %11 = arith.addf %7, %10 : vector<8x128xf32>
    %cst_8 = arith.constant 0.000000e+00 : f32
    %12 = vector.broadcast %cst_8 : f32 to vector<8x128xf32>
    %13 = arith.maximumf %11, %12 : vector<8x128xf32>
    %14 = arith.truncf %13 : vector<8x128xf32> to vector<8x128xbf16>
    %c0_9 = arith.constant 0 : index
    %c0_10 = arith.constant 0 : index
    %c0_11 = arith.constant 0 : index
    %15 = vector.load %arg5[%c0_9, %c0_10, %c0_11] : memref<1x128x128xbf16, #tpu.memory_space<vmem>>, vector<1x128x128xbf16>
    %16 = vector.shape_cast %15 : vector<1x128x128xbf16> to vector<128x128xbf16>
    %cst_12 = arith.constant dense<0.000000e+00> : vector<8x128xf32>
    %17 = tpu.matmul %14, %16, %cst_12 {dimension_numbers = #tpu.dot_dimension_numbers<[1], [0], [0], [1], [0, 0, 1, 1], [], []>} : vector<8x128xbf16>, vector<128x128xbf16>, vector<8x128xf32> -> vector<8x128xf32>
    %c0_13 = arith.constant 0 : index
    %c0_14 = arith.constant 0 : index
    %c0_15 = arith.constant 0 : index
    %18 = vector.load %arg6[%c0_13, %c0_14, %c0_15] : memref<1x1x128xf32, #tpu.memory_space<vmem>>, vector<1x1x128xf32>
    %19 = vector.shape_cast %18 : vector<1x1x128xf32> to vector<1x128xf32>
    %20 = vector.broadcast %19 : vector<1x128xf32> to vector<8x128xf32>
    %21 = arith.addf %17, %20 : vector<8x128xf32>
    %cst_16 = arith.constant 0.000000e+00 : f32
    %22 = vector.broadcast %cst_16 : f32 to vector<8x128xf32>
    %23 = arith.maximumf %21, %22 : vector<8x128xf32>
    %24 = arith.truncf %23 : vector<8x128xf32> to vector<8x128xbf16>
    %c0_17 = arith.constant 0 : index
    %c0_18 = arith.constant 0 : index
    %c0_19 = arith.constant 0 : index
    %25 = vector.load %arg7[%c0_17, %c0_18, %c0_19] : memref<1x128x128xbf16, #tpu.memory_space<vmem>>, vector<1x128x128xbf16>
    %26 = vector.shape_cast %25 : vector<1x128x128xbf16> to vector<128x128xbf16>
    %cst_20 = arith.constant dense<0.000000e+00> : vector<8x128xf32>
    %27 = tpu.matmul %24, %26, %cst_20 {dimension_numbers = #tpu.dot_dimension_numbers<[1], [0], [0], [1], [0, 0, 1, 1], [], []>} : vector<8x128xbf16>, vector<128x128xbf16>, vector<8x128xf32> -> vector<8x128xf32>
    %c0_21 = arith.constant 0 : index
    %c0_22 = arith.constant 0 : index
    %c0_23 = arith.constant 0 : index
    %28 = vector.load %arg8[%c0_21, %c0_22, %c0_23] : memref<1x1x128xf32, #tpu.memory_space<vmem>>, vector<1x1x128xf32>
    %29 = vector.shape_cast %28 : vector<1x1x128xf32> to vector<1x128xf32>
    %30 = vector.broadcast %29 : vector<1x128xf32> to vector<8x128xf32>
    %31 = arith.addf %27, %30 : vector<8x128xf32>
    %cst_24 = arith.constant 0.000000e+00 : f32
    %32 = vector.broadcast %cst_24 : f32 to vector<8x128xf32>
    %33 = arith.maximumf %31, %32 : vector<8x128xf32>
    %c0_25 = arith.constant 0 : index
    %c0_26 = arith.constant 0 : index
    %c0_27 = arith.constant 0 : index
    %34 = vector.load %arg9[%c0_25, %c0_26, %c0_27] : memref<1x128x128xbf16, #tpu.memory_space<vmem>>, vector<1x128x128xbf16>
    %35 = vector.shape_cast %34 : vector<1x128x128xbf16> to vector<128x128xbf16>
    %cst_28 = arith.constant dense<0.000000e+00> : vector<8x128xf32>
    %36 = tpu.matmul %4, %35, %cst_28 {dimension_numbers = #tpu.dot_dimension_numbers<[1], [0], [0], [1], [0, 0, 1, 1], [], []>} : vector<8x128xbf16>, vector<128x128xbf16>, vector<8x128xf32> -> vector<8x128xf32>
    %37 = arith.addf %33, %36 : vector<8x128xf32>
    %c0_29 = arith.constant 0 : index
    %c0_30 = arith.constant 0 : index
    %c0_31 = arith.constant 0 : index
    %38 = vector.load %arg10[%c0_29, %c0_30, %c0_31] : memref<1x1x128xf32, #tpu.memory_space<vmem>>, vector<1x1x128xf32>
    %39 = vector.shape_cast %38 : vector<1x1x128xf32> to vector<1x128xf32>
    %40 = vector.broadcast %39 : vector<1x128xf32> to vector<8x128xf32>
    %41 = arith.addf %37, %40 : vector<8x128xf32>
    %c0_32 = arith.constant 0 : index
    %c0_33 = arith.constant 0 : index
    %42 = vector.load %arg12[%c0_32, %c0_33] : memref<8x128xf32, #tpu.memory_space<vmem>>, vector<8x128xf32>
    tpu.vector_store %arg12[%c0_32, %c0_33], %41 {strides = array<i32>} : memref<8x128xf32, #tpu.memory_space<vmem>>, vector<8x128xf32>,
    %c1_i32 = arith.constant 1 : i32
    %43 = arith.cmpi eq, %arg1, %c1_i32 : i32
    %44 = arith.extui %43 : i1 to i32
    %c0_i32_34 = arith.constant 0 : i32
    %45 = arith.cmpi ne, %44, %c0_i32_34 : i32
    scf.if %45 {
      %c0_35 = arith.constant 0 : index
      %c0_36 = arith.constant 0 : index
      %46 = vector.load %arg11[%c0_35, %c0_36] : memref<8x128xf32, #tpu.memory_space<vmem>>, vector<8x128xf32>
      tpu.vector_store %arg11[%c0_35, %c0_36], %41 {strides = array<i32>} : memref<8x128xf32, #tpu.memory_space<vmem>>, vector<8x128xf32>,
    } else {
    }
    return
  }
  func.func @transform_0(%arg0: i32, %arg1: i32) -> (i32, i32) {
    %c0_i32 = arith.constant 0 : i32
    %c0_i32_0 = arith.constant 0 : i32
    return %arg0, %c0_i32 : i32, i32
  }
  func.func @transform_1(%arg0: i32, %arg1: i32) -> (i32, i32, i32) {
    %c0_i32 = arith.constant 0 : i32
    %c0_i32_0 = arith.constant 0 : i32
    %c0_i32_1 = arith.constant 0 : i32
    return %arg1, %c0_i32, %c0_i32_0 : i32, i32, i32
  }
  func.func @transform_2(%arg0: i32, %arg1: i32) -> (i32, i32, i32) {
    %c0_i32 = arith.constant 0 : i32
    %c0_i32_0 = arith.constant 0 : i32
    %c0_i32_1 = arith.constant 0 : i32
    return %arg1, %c0_i32, %c0_i32_0 : i32, i32, i32
  }
  func.func @transform_3(%arg0: i32, %arg1: i32) -> (i32, i32, i32) {
    %c0_i32 = arith.constant 0 : i32
    %c0_i32_0 = arith.constant 0 : i32
    %c0_i32_1 = arith.constant 0 : i32
    return %arg1, %c0_i32, %c0_i32_0 : i32, i32, i32
  }
  func.func @transform_4(%arg0: i32, %arg1: i32) -> (i32, i32, i32) {
    %c0_i32 = arith.constant 0 : i32
    %c0_i32_0 = arith.constant 0 : i32
    %c0_i32_1 = arith.constant 0 : i32
    return %arg1, %c0_i32, %c0_i32_0 : i32, i32, i32
  }
  func.func @transform_5(%arg0: i32, %arg1: i32) -> (i32, i32, i32) {
    %c0_i32 = arith.constant 0 : i32
    %c0_i32_0 = arith.constant 0 : i32
    %c0_i32_1 = arith.constant 0 : i32
    return %arg1, %c0_i32, %c0_i32_0 : i32, i32, i32
  }
  func.func @transform_6(%arg0: i32, %arg1: i32) -> (i32, i32, i32) {
    %c0_i32 = arith.constant 0 : i32
    %c0_i32_0 = arith.constant 0 : i32
    %c0_i32_1 = arith.constant 0 : i32
    return %arg1, %c0_i32, %c0_i32_0 : i32, i32, i32
  }
  func.func @transform_7(%arg0: i32, %arg1: i32) -> (i32, i32, i32) {
    %c0_i32 = arith.constant 0 : i32
    %c0_i32_0 = arith.constant 0 : i32
    %c0_i32_1 = arith.constant 0 : i32
    return %arg1, %c0_i32, %c0_i32_0 : i32, i32, i32
  }
  func.func @transform_8(%arg0: i32, %arg1: i32) -> (i32, i32, i32) {
    %c0_i32 = arith.constant 0 : i32
    %c0_i32_0 = arith.constant 0 : i32
    %c0_i32_1 = arith.constant 0 : i32
    return %arg1, %c0_i32, %c0_i32_0 : i32, i32, i32
  }
  func.func @transform_9(%arg0: i32, %arg1: i32) -> (i32, i32) {
    %c0_i32 = arith.constant 0 : i32
    %c0_i32_0 = arith.constant 0 : i32
    return %arg0, %c0_i32 : i32, i32
  }
}

</mosaic_0001>

<bundles_post_ra>
// kernel: encoder_forward.1
= control target key start
LH: loop header
LB: loop body
LE: loop exit
PB: predicated region body
PF: predicated region fallthrough
CT: control target
= control target key end

     0   :  { %s2170_s0 = inlined_call_operand.vmem [shape: f32[8,128], index: 0, kind: input, shape index: {}]   ;;  %s2171_s1 = inlined_call_operand.hbm [shape: bf16[2,128,128], index: 1, kind: input, shape index: {}]   ;;  %s2172_s2 = inlined_call_operand.vmem [shape: f32[2,1,128], index: 2, kind: input, shape index: {}]   ;;  %s2173_s3 = inlined_call_operand.hbm [shape: bf16[2,128,128], index: 3, kind: input, shape index: {}]   ;;  %s2174_s4 = inlined_call_operand.vmem [shape: f32[2,1,128], index: 4, kind: input, shape index: {}]   ;;  %s2175_s5 = inlined_call_operand.hbm [shape: bf16[2,128,128], index: 5, kind: input, shape index: {}]   ;;  %s2176_s6 = inlined_call_operand.vmem [shape: f32[2,1,128], index: 6, kind: input, shape index: {}]   ;;  %s2177_s7 = inlined_call_operand.hbm [shape: bf16[2,128,128], index: 7, kind: input, shape index: {}]   ;;  %s2178_s8 = inlined_call_operand.vmem [shape: f32[2,1,128], index: 8, kind: input, shape index: {}]   ;;  %s2179_s9 = inlined_call_operand.hbm [shape: f32[8,128], index: 9, kind: output, shape index: {}]  }
   0x1   :  { %2189 = sst [smem:[#allocation21_spill]] %s2171_s1 }
   0x2   :  { %2190 = sst [smem:[#allocation22_spill]] %s2173_s3 }
   0x3   :  { %14 = vsyncpa [#allocation4], 0 }
   0x4   :  { %16 = vsyncpa [#allocation4 + $0x1], 0 }
   0x5   :  { %17 = vsyncpa [#allocation7], 0 }
   0x6   :  { %19 = vsyncpa [#allocation7 + $0x1], 0 }
   0x7   :  { %20 = vsyncpa [#allocation10], 0 }
   0x8   :  { %22 = vsyncpa [#allocation10 + $0x1], 0 }
   0x9   :  { %23 = vsyncpa [#allocation5], 0  ;;  %s1764_s30 = smov 0   ;;  %s1766_s10 = smov 0  }
   0xa   :  { %s1768_s11 = smov 0   ;;  %s1770_s12 = smov 0  }
   0xb   :  { %s1772_s13 = smov 0   ;;  %s1774_s14 = smov 0  }
   0xc LB: > { %2191 = sst [smem:[#allocation16_spill]] %s1691_s11  ;;  %s1793_s15 = sadd.s32 4294967295, %s1703_s14   ;;  %s1703_s14 = sphi %s1774_s14, %s29_s14   ;;  %s1699_s13 = sphi %s1772_s13, %s2214_s13   ;;  %s1695_s12 = sphi %s1770_s12, %s2210_s12   ;;  %s1691_s11 = sphi %s1768_s11, %s2209_s11   ;;  %s1687_s10 = sphi %s1766_s10, %s2213_s10   ;;  %s1683_s30 = sphi %s1764_s30, %s2212_s30  }
   0xd   : > { %2192 = sst [smem:[#allocation17_spill]] %s1699_s13  ;;  %s38_s16 = sadd.s32 1, %s1699_s13 }
   0xe   : > { %2193 = sst [smem:[#allocation18_spill]] %s1703_s14  ;;  %p39_p0 = scmp.ge.s32.totalorder %s38_s16, 2 }
   0xf   : > { %s74_s17 = sadd.s32 1, %s1691_s11  ;;  %p81_p1 = scmp.ne.s32.totalorder %s1691_s11, %s1687_s10 }
  0x10   : > { %p82_p2 = scmp.eq.s32.totalorder %s1703_s14, 0  ;;  %s2216_s16 = smov (%p39_p0, %s38_s16), 0 }
  0x11   : > { %2194 = sst [smem:[#allocation19_spill]] %s2216_s16  ;;  %p87_p4 = scmp.ne.s32.totalorder %s1687_s10, %s1683_s30 }
  0x12   : > { %p83_p3 = por %p82_p2, %p81_p1  ;;  %s71_s18 = ssub.s32 %s1699_s13, %s2216_s16 }
  0x13   : > { %p88_p5 = scmp.eq.s32.totalorder %s1793_s15, 0  ;;  %p72_p6 = scmp.eq.s32.totalorder %s71_s18, 0 }
  0x14   : > { %p1407_p8 = scmp.lt.s32.totalorder %s1703_s14, 2  ;;  %s1815_s21 = sand.u32 1, %s1691_s11  }
  0x15   : > { %p1806_p7 = por %p88_p5, %p87_p4  ;;  %s1818_s22 = sshll.u32 %s1699_s13, 10 }
  0x16   : > { %s1812_s20 = scalar_select %p72_p6, %s1691_s11, %s74_s17  }
  0x17   : > { %s2195_s19 = scalar_select %p1806_p7, 1, 0 }
  0x18   : > { %2196 = sst [smem:[#allocation20_spill]] %s1812_s20  ;;  %s1821_s23 = sshll.u32 %s1815_s21, 6 }
  0x19   : > { %p1823_p9 = pnand %p1407_p8, %p83_p3  ;;  %s353_s25 = sand.u32 1, %s1703_s14  }
  0x1a   : > { %s2198_s3 = sld [smem:[#allocation22_spill]]  ;;  %s357_s29 = scalar_lea.vmem [#allocation6], %s1821_s23 }
  0x1b   : > { %s364_s30 = sshll.u32 %s357_s29, 4  ;;  %s1838_s17 = scalar_lea.sflag [#allocation7], %s353_s25  ;;  %s1835_s30 = int_to_ptr.vmem [resolvable:$true] %s364_s30 }
  0x1c   : > { %p1844_p12 = pneg %p1823_p9 }
  0x20   : > { %s1832_s28 = scalar_lea.hbm %s2198_s3, %s1818_s22  ;;  %s1500_s29 = scalar_lea.hbm %s2198_s3, 2048 }
  0x21   : > { %s1495_s18 = scalar_lea.hbm %s1832_s28, 1024  ;;  %p1501_p1 = scmp.lt.u32.totalorder %s1832_s28, %s2198_s3 }
  0x22   : > { %p1496_p11 = scmp.ne.s32.totalorder %s1832_s28, %s1495_s18  ;;  %p1502_p2 = scmp.lt.u32.totalorder %s1500_s29, %s1495_s18 }
  0x23   : > { %p1504_p4 = scmp.lt.u32.totalorder %s1495_s18, %s1832_s28 }
  0x24   : > { %p1498_p13 = pnand %p1844_p12, %p1496_p11  ;;  %p1503_p3 = por %p1502_p2, %p1501_p1 }
  0x26   : > { %p1499_p0 = pneg %p1498_p13  ;;  %p1505_p5 = por %p1504_p4, %p1503_p3 }
  0x28   : > { %p1506_p6 = pnand %p1505_p5, %p1499_p0 }
  0x2a   : > { %1509 = shalt.err (!%p1506_p6)
}
  0x2b   : > { %s1510_s25 = scalar_lea.vmem %s1835_s30, 1024  ;;  %s1705_s26 = smov [#allocation6]  }
  0x2c   : > { %p1511_p8 = scmp.ne.s32.totalorder %s1835_s30, %s1510_s25  ;;  %s1515_s27 = sshll.u32 %s1705_s26, 4  ;;  %s1516_s27 = int_to_ptr.vmem [resolvable:$false] %s1515_s27 }
  0x2d   : > { %s1517_s13 = scalar_lea.vmem %s1516_s27, 2048  ;;  %p1518_p10 = scmp.lt.s32.totalorder %s1835_s30, %s1516_s27 }
  0x2e   : > { %p1513_p11 = pnand %p1511_p8, %p1844_p12  ;;  %p1519_p7 = scmp.lt.s32.totalorder %s1517_s13, %s1510_s25 }
  0x30   : > { %p1514_p13 = pneg %p1513_p11  ;;  %p1520_p1 = por %p1519_p7, %p1518_p10 }
  0x32   : > { %p1521_p2 = pnand %p1520_p1, %p1514_p13 }
  0x34   : > { %1524 = shalt.err (!%p1521_p2)
}
  0x35   : > { %s2183_s20 = smov 64   ;;  %s2185_s18 = smov 4  }
  0x36   : > { %1400 = dma.hbm_to_vmem [thread:$0]  (!%p1823_p9), %s1832_s28, 1024, %s1835_s30, %s1838_s17, %s2183_s20, %s2183_s20, %s2185_s18  }
  0x37   : > { %p432_p7 = scmp.lt.s32.totalorder %s1703_s14, 3  ;;  %p2200_p10 = scmp.ge.s32.totalorder %s1703_s14, 1 }
  0x38   : > { %s2202_s1 = sld [smem:[#allocation21_spill]]  ;;  %s330_s13 = scalar_lea.vmem [#allocation3], %s1821_s23 }
  0x39   : > { %p1874_p0 = pnand %p2200_p10, %p432_p7  ;;  %s337_s3 = sshll.u32 %s330_s13, 4  ;;  %s1885_s3 = int_to_ptr.vmem [resolvable:$true] %s337_s3 }
  0x3a   : > { %s327_s28 = scalar_lea.sflag [#allocation4], %s1815_s21 }
  0x3b   : > { %s2201_s29 = scalar_select %p1874_p0, 1, 0 }
  0x3e   : > { %s1882_s27 = scalar_lea.hbm %s2202_s1, %s1818_s22  ;;  %s1530_s25 = scalar_lea.hbm %s2202_s1, 2048 }
  0x3f   : > { %s1525_s30 = scalar_lea.hbm %s1882_s27, 1024  ;;  %p1531_p6 = scmp.lt.u32.totalorder %s1882_s27, %s2202_s1 }
  0x40   : > { %p1526_p3 = scmp.ne.s32.totalorder %s1882_s27, %s1525_s30  ;;  %p1532_p8 = scmp.lt.u32.totalorder %s1530_s25, %s1525_s30 }
  0x41   : > { %p1534_p13 = scmp.lt.u32.totalorder %s1525_s30, %s1882_s27 }
  0x42   : > { %p1528_p4 = pnand %p1526_p3, %p1844_p12  ;;  %p1533_p11 = por %p1532_p8, %p1531_p6 }
  0x44   : > { %p1529_p5 = pneg %p1528_p4  ;;  %p1535_p1 = por %p1534_p13, %p1533_p11 }
  0x46   : > { %p1536_p2 = pnand %p1535_p1, %p1529_p5 }
  0x48   : > { %1539 = shalt.err (!%p1536_p2)
}
  0x49   : > { %s1540_s13 = scalar_lea.vmem %s1885_s3, 1024  ;;  %s1708_s20 = smov [#allocation3]  }
  0x4a   : > { %p1541_p7 = scmp.ne.s32.totalorder %s1885_s3, %s1540_s13  ;;  %s1545_s18 = sshll.u32 %s1708_s20, 4  ;;  %s1546_s18 = int_to_ptr.vmem [resolvable:$false] %s1545_s18 }
  0x4b   : > { %s1547_s11 = scalar_lea.vmem %s1546_s18, 2048  ;;  %p1548_p4 = scmp.lt.s32.totalorder %s1885_s3, %s1546_s18 }
  0x4c   : > { %p1543_p10 = pnand %p1541_p7, %p1844_p12  ;;  %p1549_p0 = scmp.lt.s32.totalorder %s1547_s11, %s1540_s13 }
  0x4e   : > { %p1544_p3 = pneg %p1543_p10  ;;  %p1550_p6 = por %p1549_p0, %p1548_p4 }
  0x50   : > { %p1551_p8 = pnand %p1550_p6, %p1544_p3 }
  0x52   : > { %1554 = shalt.err (!%p1551_p8)
}
  0x53   : > { %s2203_s30 = smov 4   ;;  %s2204_s25 = smov 64  }
  0x54   : > { %1397 = dma.hbm_to_vmem [thread:$0]  (!%p1823_p9), %s1882_s27, 1024, %s1885_s3, %s327_s28, %s2204_s25, %s2204_s25, %s2203_s30  }
  0x55   : > { %s1918_s13 = scalar_lea.hbm %s2175_s5, %s1818_s22  ;;  %s384_s18 = scalar_lea.vmem [#allocation8], %s1821_s23 }
  0x56   : > { %s391_s11 = sshll.u32 %s384_s18, 4  ;;  %s1555_s1 = scalar_lea.hbm %s1918_s13, 1024  ;;  %s1921_s11 = int_to_ptr.vmem [resolvable:$true] %s391_s11 }
  0x57   : > { %p1556_p0 = scmp.ne.s32.totalorder %s1918_s13, %s1555_s1  ;;  %s1560_s27 = scalar_lea.hbm %s2175_s5, 2048 }
  0x58   : > { %p1561_p13 = scmp.lt.u32.totalorder %s1918_s13, %s2175_s5  ;;  %p1562_p1 = scmp.lt.u32.totalorder %s1560_s27, %s1555_s1 }
  0x59   : > { %p1558_p5 = pnand %p1556_p0, %p1844_p12  ;;  %p1564_p7 = scmp.lt.u32.totalorder %s1555_s1, %s1918_s13 }
  0x5a   : > { %p1563_p2 = por %p1562_p1, %p1561_p13 }
  0x5b   : > { %p1559_p11 = pneg %p1558_p5 }
  0x5c   : > { %p1565_p10 = por %p1564_p7, %p1563_p2 }
  0x5e   : > { %p1566_p3 = pnand %p1565_p10, %p1559_p11 }
  0x60   : > { %1569 = shalt.err (!%p1566_p3)
}
  0x61   : > { %s1570_s20 = scalar_lea.vmem %s1921_s11, 1024  ;;  %s1709_s14 = smov [#allocation8]  }
  0x62   : > { %p1571_p4 = scmp.ne.s32.totalorder %s1921_s11, %s1570_s20  ;;  %s1575_s18 = sshll.u32 %s1709_s14, 4  ;;  %s1576_s18 = int_to_ptr.vmem [resolvable:$false] %s1575_s18 }
  0x63   : > { %s1577_s3 = scalar_lea.vmem %s1576_s18, 2048  ;;  %p1578_p0 = scmp.lt.s32.totalorder %s1921_s11, %s1576_s18 }
  0x64   : > { %p1573_p6 = pnand %p1571_p4, %p1844_p12  ;;  %p1579_p5 = scmp.lt.s32.totalorder %s1577_s3, %s1570_s20 }
  0x66   : > { %p1574_p8 = pneg %p1573_p6  ;;  %p1580_p13 = por %p1579_p5, %p1578_p0 }
  0x68   : > { %p1581_p1 = pnand %p1580_p13, %p1574_p8 }
  0x6a   : > { %1584 = shalt.err (!%p1581_p1)
}
  0x6b   : > { %1403 = dma.hbm_to_vmem [thread:$0]  (!%p1823_p9), %s1918_s13, 1024, %s1921_s11, %s1838_s17, %s2204_s25, %s2204_s25, %s2203_s30  }
  0x6c   : > { %s1952_s28 = scalar_lea.hbm %s2177_s7, %s1818_s22  ;;  %s411_s26 = scalar_lea.vmem [#allocation9], %s1821_s23 }
  0x6d   : > { %s418_s20 = sshll.u32 %s411_s26, 4  ;;  %s408_s14 = scalar_lea.sflag [#allocation10], %s1815_s21  ;;  %s1955_s20 = int_to_ptr.vmem [resolvable:$true] %s418_s20 }
  0x6e   : > { %s1585_s18 = scalar_lea.hbm %s1952_s28, 1024  ;;  %s1590_s11 = scalar_lea.hbm %s2177_s7, 2048 }
  0x6f   : > { %p1586_p11 = scmp.ne.s32.totalorder %s1952_s28, %s1585_s18  ;;  %p1591_p10 = scmp.lt.u32.totalorder %s1952_s28, %s2177_s7 }
  0x70   : > { %p1592_p3 = scmp.lt.u32.totalorder %s1590_s11, %s1585_s18  ;;  %p1594_p6 = scmp.lt.u32.totalorder %s1585_s18, %s1952_s28 }
  0x71   : > { %p1588_p2 = pnand %p1586_p11, %p1844_p12 }
  0x72   : > { %p1593_p4 = por %p1592_p3, %p1591_p10 }
  0x73   : > { %p1589_p7 = pneg %p1588_p2 }
  0x74   : > { %p1595_p8 = por %p1594_p6, %p1593_p4 }
  0x76   : > { %p1596_p0 = pnand %p1595_p8, %p1589_p7 }
  0x78   : > { %1599 = shalt.err (!%p1596_p0)
}
  0x79   : > { %s1600_s23 = scalar_lea.vmem %s1955_s20, 1024  ;;  %s1710_s1 = smov [#allocation9]  }
  0x7a   : > { %p1601_p5 = scmp.ne.s32.totalorder %s1955_s20, %s1600_s23  ;;  %s1605_s27 = sshll.u32 %s1710_s1, 4  ;;  %s1606_s27 = int_to_ptr.vmem [resolvable:$false] %s1605_s27 }
  0x7b   : > { %s1607_s26 = scalar_lea.vmem %s1606_s27, 2048  ;;  %p1608_p11 = scmp.lt.s32.totalorder %s1955_s20, %s1606_s27 }
  0x7c   : > { %p1603_p13 = pnand %p1601_p5, %p1844_p12  ;;  %p1609_p2 = scmp.lt.s32.totalorder %s1607_s26, %s1600_s23 }
  0x7e   : > { %p1604_p1 = pneg %p1603_p13  ;;  %p1610_p10 = por %p1609_p2, %p1608_p11 }
  0x80   : > { %p1611_p3 = pnand %p1610_p10, %p1604_p1 }
  0x82   : > { %1614 = shalt.err (!%p1611_p3)
}
  0x83   : > { %1406 = dma.hbm_to_vmem [thread:$0]  (!%p1823_p9), %s1952_s28, 1024, %s1955_s20, %s408_s14, %s2204_s25, %s2204_s25, %s2203_s30  }
  0x84   : > { %p2205_p12 = scmp.ne.s32.totalorder %s2201_s29, 0 }
  0x85   : > { %s438_s16 = sand.u32 (!%p2205_p12), 1, %s1687_s10   ;;  %p2206_p7 = scmp.ne.s32.totalorder (!%p2205_p12), %s2195_s19, 0 }
  0x86   : > { %436 = sbr.rel (%p2205_p12) target bundleno = 873 (0x369), region = 56  ;;  %s1216_s18 = sshll.u32 (!%p2205_p12), %s438_s16, 6 }
  0x87   : > { %s439_s17 = scalar_lea.sflag (!%p2205_p12), [#allocation4], %s438_s16  ;;  %s1987_s13 = scalar_lea.vmem (!%p2205_p12), [#allocation3], %s1216_s18 }
  0x8d   : > { %1666 = dma.done.wait (%p2206_p7), %s439_s17, 1024  }
  0x8e   : > { %1668 = vsyncadd (%p2206_p7), %s439_s17, 4294966272  ;;  %s447_s21 = sand.u32 1, %s1793_s15   ;;  %s1994_s30 = scalar_lea.vmem [#allocation6], %s1216_s18 }
  0x8f   : > { %s448_s24 = scalar_lea.sflag [#allocation7], %s447_s21 }
  0x90   : > { %1670 = dma.done.wait (%p2206_p7), %s448_s24, 2048  }
  0x91   : > { %1672 = vsyncadd (%p2206_p7), %s448_s24, 4294965248  ;;  %s2000_s29 = scalar_lea.vmem [#allocation8], %s1216_s18  ;;  %s466_s25 = scalar_lea.sflag [#allocation10], %s438_s16 }
  0x92   : > { %s2002_s28 = scalar_lea.vmem [#allocation9], %s1216_s18 }
  0x93   : > { %1674 = dma.done.wait (%p2206_p7), %s466_s25, 1024  }
  0x94   : > { %1676 = vsyncadd (%p2206_p7), %s466_s25, 4294966272  ;;  %p534_p9 = scmp.lt.s32.totalorder %s1695_s12, 1  ;;  %p1220_p4 = scmp.ne.s32.totalorder %s1695_s12, 0 }
  0x95   : > { %v551_v0 = vld [vmem:[%s2170_s0] sm:$0xff] (!%p1220_p4) }
  0x96   : > { %s2010_s20 = scalar_select %p534_p9, %s1695_s12, 1 }
  0x97   : > { %550 = sbr.rel (%p1220_p4) target bundleno = 158 (0x9e), region = 76  ;;  %552 = vst [vmem:[#allocation2] sm:$0xff] (!%p1220_p4), %v551_v0 }
  0x98   : > { %s536_s22 = scalar_lea.vmem %s2172_s2, %s2010_s20  ;;  %s539_s1 = scalar_lea.vmem %s2174_s4, %s2010_s20 }
  0x99   : > { %s542_s26 = scalar_lea.vmem %s2176_s6, %s2010_s20  ;;  %s545_s17 = scalar_lea.vmem %s2178_s8, %s2010_s20 }
  0x9e PF: > { %v1463_v1 = vld [vmem:[%s1987_s13] sm:$0xff]   ;;  %v1711_v2 = vmov 0.0   ;;  %v1464_v3 = vld [vmem:[%s1987_s13 + $0x8] sm:$0xff]   ;;  %vm1712_vm0 = vmmov 0   ;;  %v1465_v4 = vld [vmem:[%s1987_s13 + $0x10] sm:$0xff]   ;;  %p1257_p6 = scmp.ne.s32.totalorder %s1695_s12, 1 }
  0x9f   : > { %1302 = vmatprep.subr.bf16.mxu0 %v1711_v2  ;;  %1322 = vmatprep.subr.bf16.mxu1 %v1711_v2  ;;  %v1471_v5 = vld [vmem:[%s1994_s30] sm:$0xff]   ;;  %v1466_v6 = vld [vmem:[%s1987_s13 + $0x18] sm:$0xff]   ;;  %v1472_v7 = vld [vmem:[%s1994_s30 + $0x8] sm:$0xff]  }
  0xa0   : > { %1303 = vmatpush3.bf16.msra.mxu0 %v1463_v1  ;;  %1318 = vmatprep.mubr.msk.bf16.mxu0 %vm1712_vm0, %v1711_v2  ;;  %v1467_v8 = vld [vmem:[%s1987_s13 + $0x20] sm:$0xff]   ;;  %v1473_v9 = vld [vmem:[%s1994_s30 + $0x10] sm:$0xff]   ;;  %v1468_v10 = vld [vmem:[%s1987_s13 + $0x28] sm:$0xff]  }
  0xa1   : > { %1304 = vmatprep.subr.bf16.mxu0 %v1711_v2  ;;  %1338 = vmatprep.mubr.msk.bf16.mxu1 %vm1712_vm0, %v1711_v2  ;;  %v1474_v11 = vld [vmem:[%s1994_s30 + $0x18] sm:$0xff]   ;;  %v1469_v12 = vld [vmem:[%s1987_s13 + $0x30] sm:$0xff]   ;;  %v1475_v13 = vld [vmem:[%s1994_s30 + $0x20] sm:$0xff]  }
  0xa2   : > { %1323 = vmatpush3.bf16.msra.mxu1 %v1471_v5  ;;  %v1470_v14 = vld [vmem:[%s1987_s13 + $0x38] sm:$0xff]   ;;  %v1476_v16 = vld [vmem:[%s1994_s30 + $0x28] sm:$0xff]   ;;  %v1477_v18 = vld [vmem:[%s1994_s30 + $0x30] sm:$0xff]  }
  0xa3   : > { %1324 = vmatprep.subr.bf16.mxu1 %v1711_v2  ;;  %v553_v15 = vld [vmem:[#allocation2] sm:$0xff]  ;;  %v1479_v20 = vld [vmem:[%s2000_s29] sm:$0xff]   ;;  %v1481_v21 = vld [vmem:[%s2000_s29 + $0x8] sm:$0xff]  }
  0xa4   : > { %1305 = vmatpush3.bf16.msra.mxu0 %v1464_v3  ;;  %v2064_v17 = vpack.c.bf16 %v553_v15, %v553_v15  ;;  %v1478_v19 = vld [vmem:[%s1994_s30 + $0x38] sm:$0xff]   ;;  %v1483_v22 = vld [vmem:[%s2000_s29 + $0x10] sm:$0xff]   ;;  %v1487_v24 = vld [vmem:[%s2000_s29 + $0x20] sm:$0xff]  }
  0xa5   : > { %1306 = vmatprep.subr.bf16.mxu0 %v1711_v2  ;;  %v1485_v23 = vld [vmem:[%s2000_s29 + $0x18] sm:$0xff]   ;;  %v1489_v25 = vld [vmem:[%s2000_s29 + $0x28] sm:$0xff]   ;;  %v1480_v33 = vld [vmem:[%s2002_s28] sm:$0xff]  }
  0xa6   : > { %1325 = vmatpush3.bf16.msra.mxu1 %v1472_v7  ;;  %v1221_v26 = vld [vmem:[%s536_s22] ss:$0 sm:$0xff]  ;;  %v1482_v35 = vld [vmem:[%s2002_s28 + $0x8] sm:$0xff]   ;;  %v1484_v36 = vld [vmem:[%s2002_s28 + $0x10] sm:$0xff]  }
  0xa7   : > { %1326 = vmatprep.subr.bf16.mxu1 %v1711_v2  ;;  %v1486_v37 = vld [vmem:[%s2002_s28 + $0x18] sm:$0xff]   ;;  %v1488_v38 = vld [vmem:[%s2002_s28 + $0x20] sm:$0xff]   ;;  %v1490_v39 = vld [vmem:[%s2002_s28 + $0x28] sm:$0xff]  }
  0xa8   : > { %1307 = vmatpush3.bf16.msra.mxu0 %v1465_v4  ;;  %v1491_v40 = vld [vmem:[%s2000_s29 + $0x30] sm:$0xff]   ;;  %v1493_v42 = vld [vmem:[%s2000_s29 + $0x38] sm:$0xff]  }
  0xa9   : > { %1308 = vmatprep.subr.bf16.mxu0 %v1711_v2  ;;  %v1492_v41 = vld [vmem:[%s2002_s28 + $0x30] sm:$0xff]   ;;  %v1494_v43 = vld [vmem:[%s2002_s28 + $0x38] sm:$0xff]  }
  0xaa   : > { %1327 = vmatpush3.bf16.msra.mxu1 %v1473_v9  ;;  %v1230_v44 = vld [vmem:[%s539_s1] ss:$0 sm:$0xff] }
  0xab   : > { %1328 = vmatprep.subr.bf16.mxu1 %v1711_v2  ;;  %v1239_v56 = vld [vmem:[%s542_s26] ss:$0 sm:$0xff] }
  0xac   : > { %1309 = vmatpush3.bf16.msra.mxu0 %v1466_v6  ;;  %v1256_v63 = vld [vmem:[%s545_s17] ss:$0 sm:$0xff] }
  0xad   : > { %1310 = vmatprep.subr.bf16.mxu0 %v1711_v2 }
  0xae   : > { %1329 = vmatpush3.bf16.msra.mxu1 %v1474_v11 }
  0xaf   : > { %1330 = vmatprep.subr.bf16.mxu1 %v1711_v2 }
  0xb0   : > { %1311 = vmatpush3.bf16.msra.mxu0 %v1467_v8 }
  0xb1   : > { %1312 = vmatprep.subr.bf16.mxu0 %v1711_v2 }
  0xb2   : > { %1331 = vmatpush3.bf16.msra.mxu1 %v1475_v13 }
  0xb3   : > { %1332 = vmatprep.subr.bf16.mxu1 %v1711_v2 }
  0xb4   : > { %1313 = vmatpush3.bf16.msra.mxu0 %v1468_v10 }
  0xb5   : > { %1314 = vmatprep.subr.bf16.mxu0 %v1711_v2 }
  0xb6   : > { %1333 = vmatpush3.bf16.msra.mxu1 %v1476_v16 }
  0xb7   : > { %1334 = vmatprep.subr.bf16.mxu1 %v1711_v2 }
  0xb8   : > { %1315 = vmatpush3.bf16.msra.mxu0 %v1469_v12 }
  0xb9   : > { %1316 = vmatprep.subr.bf16.mxu0 %v1711_v2 }
  0xba   : > { %1335 = vmatpush3.bf16.msra.mxu1 %v1477_v18 }
  0xbb   : > { %1336 = vmatprep.subr.bf16.mxu1 %v1711_v2 }
  0xbc   : > { %1317 = vmatpush3.bf16.msra.mxu0 %v1470_v14 }
  0xbd   : > { %1342 = vmatprep.subr.bf16.mxu0 %v1711_v2 }
  0xbe   : > { %1337 = vmatpush3.bf16.msra.mxu1 %v1478_v19 }
  0xbf   : > { %1319 = vmatmul.mubr.bf16.vlgmr.msra.gmra.mrb[0].mxu0 %v2064_v17  ;;  %1362 = vmatprep.subr.bf16.mxu1 %v1711_v2 }
  0xc0   : > { %1358 = vmatprep.mubr.msk.bf16.mxu0 %vm1712_vm0, %v1711_v2  ;;  %1343 = vmatpush3.bf16.msra.mxu0 %v1479_v20 }
  0xc1   : > { %1344 = vmatprep.subr.bf16.mxu0 %v1711_v2 }
  0xc4   : > { %1345 = vmatpush3.bf16.msra.mxu0 %v1481_v21 }
  0xc5   : > { %1346 = vmatprep.subr.bf16.mxu0 %v1711_v2 }
  0xc8   : > { %1347 = vmatpush3.bf16.msra.mxu0 %v1483_v22 }
  0xc9   : > { %1348 = vmatprep.subr.bf16.mxu0 %v1711_v2 }
  0xcc   : > { %1349 = vmatpush3.bf16.msra.mxu0 %v1485_v23 }
  0xcd   : > { %1350 = vmatprep.subr.bf16.mxu0 %v1711_v2 }
  0xd0   : > { %1351 = vmatpush3.bf16.msra.mxu0 %v1487_v24 }
  0xd1   : > { %1352 = vmatprep.subr.bf16.mxu0 %v1711_v2 }
  0xd4   : > { %1353 = vmatpush3.bf16.msra.mxu0 %v1489_v25 }
  0xd5   : > { %1354 = vmatprep.subr.bf16.mxu0 %v1711_v2 }
  0xd8   : > { %1355 = vmatpush3.bf16.msra.mxu0 %v1491_v40 }
  0xd9   : > { %1356 = vmatprep.subr.bf16.mxu0 %v1711_v2 }
  0xdc   : > { %1357 = vmatpush3.bf16.msra.mxu0 %v1493_v42 }
 0x192   : > { %v660_v27 = vpop.f32.mrb[0].mxu0 }
 0x193   : > { %v661_v28 = vadd.f32 %v1221_v26, %v660_v27  ;;  %v1320_v29 = vpop.f32.mrb[1].mxu0 }
 0x194   : > { %v663_v30 = vpop.f32.mrb[2].mxu0 }
 0x195   : > { %v666_v31 = vmax.f32 %v661_v28, 0.0  ;;  %v1321_v32 = vpop.f32.mrb[3].mxu0 }
 0x197   : > { %v667_v34 = vpack.c.bf16 %v666_v31, %v666_v31 }
 0x199   : > { %1339 = vmatmul.mubr.bf16.vlgmr.msra.gmra.mrb[0].mxu1 %v667_v34 }
 0x19a   : > { %1363 = vmatpush3.bf16.msra.mxu1 %v1480_v33  ;;  %1378 = vmatprep.mubr.msk.bf16.mxu1 %vm1712_vm0, %v1711_v2 }
 0x19b   : > { %1364 = vmatprep.subr.bf16.mxu1 %v1711_v2 }
 0x19e   : > { %1365 = vmatpush3.bf16.msra.mxu1 %v1482_v35 }
 0x19f   : > { %1366 = vmatprep.subr.bf16.mxu1 %v1711_v2 }
 0x1a2   : > { %1367 = vmatpush3.bf16.msra.mxu1 %v1484_v36 }
 0x1a3   : > { %1368 = vmatprep.subr.bf16.mxu1 %v1711_v2 }
 0x1a6   : > { %1369 = vmatpush3.bf16.msra.mxu1 %v1486_v37 }
 0x1a7   : > { %1370 = vmatprep.subr.bf16.mxu1 %v1711_v2 }
 0x1aa   : > { %1371 = vmatpush3.bf16.msra.mxu1 %v1488_v38 }
 0x1ab   : > { %1372 = vmatprep.subr.bf16.mxu1 %v1711_v2 }
 0x1ae   : > { %1373 = vmatpush3.bf16.msra.mxu1 %v1490_v39 }
 0x1af   : > { %1374 = vmatprep.subr.bf16.mxu1 %v1711_v2 }
 0x1b2   : > { %1375 = vmatpush3.bf16.msra.mxu1 %v1492_v41 }
 0x1b3   : > { %1376 = vmatprep.subr.bf16.mxu1 %v1711_v2 }
 0x1b6   : > { %1377 = vmatpush3.bf16.msra.mxu1 %v1494_v43 }
 0x1b9   : > { %1379 = vmatmul.mubr.bf16.vlgmr.msra.gmra.mrb[4].mxu1 %v2064_v17 }
 0x26c   : > { %v773_v45 = vpop.f32.mrb[0].mxu1 }
 0x26d   : > { %v774_v46 = vadd.f32 %v1230_v44, %v773_v45  ;;  %v1340_v47 = vpop.f32.mrb[1].mxu1 }
 0x26e   : > { %v776_v48 = vpop.f32.mrb[2].mxu1 }
 0x26f   : > { %v779_v49 = vmax.f32 %v774_v46, 0.0  ;;  %v1341_v50 = vpop.f32.mrb[3].mxu1 }
 0x271   : > { %v780_v51 = vpack.c.bf16 %v779_v49, %v779_v49 }
 0x273   : > { %1359 = vmatmul.mubr.bf16.vlgmr.msra.gmra.mrb[4].mxu0 %v780_v51 }
 0x28c   : > { %v991_v52 = vpop.f32.mrb[4].mxu1 }
 0x28d   : > { %v1380_v53 = vpop.f32.mrb[5].mxu1 }
 0x28e   : > { %v994_v54 = vpop.f32.mrb[6].mxu1 }
 0x28f   : > { %v1381_v55 = vpop.f32.mrb[7].mxu1 }
 0x346   : > { %v886_v57 = vpop.f32.mrb[4].mxu0 }
 0x347   : > { %v887_v58 = vadd.f32 %v1239_v56, %v886_v57  ;;  %v1360_v59 = vpop.f32.mrb[5].mxu0 }
 0x348   : > { %v889_v60 = vpop.f32.mrb[6].mxu0 }
 0x349   : > { %v892_v61 = vmax.f32 %v887_v58, 0.0  ;;  %v1361_v62 = vpop.f32.mrb[7].mxu0  ;;  %1010 = sbr.rel (%p1257_p6) target bundleno = 848 (0x350), region = 80 }
 0x34b   : > { %v997_v0 = vadd.f32 %v991_v52, %v892_v61 }
 0x34d   : > { %v1005_v1 = vadd.f32 %v1256_v63, %v997_v0 }
 0x34f   : > { %1006 = vst [vmem:[#allocation2] sm:$0xff] %v1005_v1  ;;  %1011 = vst [vmem:[#allocation11] sm:$0xff] (!%p1257_p6), %v1005_v1 }
 0x350 PF: > { %p1408_p8 = scmp.eq.s32.totalorder %s1793_s15, 1  ;;  %s1713_s3 = smov [#allocation11]  }
 0x351   : > { %s1021_s23 = sshll.u32 %s1713_s3, 4  ;;  %s1022_s23 = int_to_ptr.vmem [resolvable:$true] %s1021_s23 }
 0x352   : > { %s1615_s1 = scalar_lea.vmem %s1022_s23, 128  ;;  %p1622_p1 = scmp.lt.s32.totalorder %s1022_s23, %s1022_s23 }
 0x353   : > { %p1616_p0 = scmp.ne.s32.totalorder %s1022_s23, %s1615_s1  ;;  %p1623_p11 = scmp.lt.s32.totalorder %s1615_s1, %s1615_s1 }
 0x355   : > { %p1617_p5 = pnand %p1616_p0, %p1408_p8  ;;  %p1624_p2 = por %p1623_p11, %p1622_p1 }
 0x357   : > { %p1618_p13 = pneg %p1617_p5 }
 0x359   : > { %p1625_p10 = pnand %p1624_p2, %p1618_p13 }
 0x35b   : > { %1628 = shalt.err (!%p1625_p10)
}
 0x35c   : > { %s1629_s27 = scalar_lea.hbm %s2179_s9, 128 }
 0x35d   : > { %p1630_p3 = scmp.ne.s32.totalorder %s2179_s9, %s1629_s27  ;;  %p1635_p9 = scmp.lt.u32.totalorder %s1629_s27, %s2179_s9 }
 0x35f   : > { %p1631_p12 = pnand %p1630_p3, %p1408_p8 }
 0x361   : > { %p1632_p7 = pneg %p1631_p12 }
 0x363   : > { %p1637_p4 = pnand %p1635_p9, %p1632_p7 }
 0x365   : > { %1640 = shalt.err (!%p1637_p4)
}
 0x366   : > { %1391 = dma.vmem_to_hbm [thread:$0]  (%p1408_p8), %s1022_s23, 128, %s2179_s9, [#allocation5]  }
 0x367   : > { %1678 = dma.done.wait (%p1408_p8), [#allocation5], 128  }
 0x368   : > { %1680 = vsyncadd (%p1408_p8), [#allocation5], 4294967168 }
 0x369 PF: > { %s2207_s24 = sld [smem:[#allocation18_spill]]  ;;  %s2208_s13 = sld [smem:[#allocation16_spill]] }
 0x36a   : > { %s2209_s11 = sld [smem:[#allocation20_spill]]  ;;  %s2210_s12 = sld [smem:[#allocation17_spill]] }
 0x36b   : > { %s2211_s25 = sld [smem:[#allocation19_spill]]  ;;  %s2212_s30 = smov %s1687_s10 }
 0x36f   : > { %s29_s14 = sadd.s32 1, %s2207_s24   ;;  %s2213_s10 = smov %s2208_s13 }
 0x370   : > { %p26_p6 = scmp.ge.s32.totalorder %s29_s14, 4  }
 0x371   : > { %s2214_s13 = smov %s2211_s25 }
 0x372   :  { %28 = sbr.rel (!%p26_p6) target bundleno = 12 (0xc), region = 154 }
 0x379   :  { %1034 = vsyncpa [#allocation4], 1 }
 0x37a   :  { %1036 = vsyncpa [#allocation4 + $0x1], 1 }
 0x37b   :  { %1037 = vsyncpa [#allocation7], 1 }
 0x37c   :  { %1039 = vsyncpa [#allocation7 + $0x1], 1 }
 0x37d   :  { %1040 = vsyncpa [#allocation10], 1 }
 0x37e   :  { %1042 = vsyncpa [#allocation10 + $0x1], 1 }
 0x37f   :  { %1043 = vsyncpa [#allocation5], 1 }
 0x380   :  { %1045 = vsyncpa [#allocation5 + $0x1], 1 }

</bundles_post_ra>
